<compile_context>
chip_gen: v5e
topology: v5e:2x2
jax: 0.10.0
libtpu: 0.0.40
codegen_flags: <defaults>
</compile_context>

<pallas_src>
import jax
import jax.numpy as jnp
from jax.experimental import pallas as pl
from jax.experimental.pallas import tpu as pltpu


# ---------------------------------------------------------------------------
# Primary (hot-path) implementation: plain identity forward + custom_vjp.
# ---------------------------------------------------------------------------
@jax.custom_vjp
def rev_grad(lam: jax.Array) -> jax.Array:
    # RevGrad forward is the identity; XLA folds this to nothing.
    return lam


def _rev_grad_fwd(lam):
    return lam, None


def _rev_grad_bwd(_, g):
    # Gradient reversal: negate the incoming cotangent.
    return (-g,)


rev_grad.defvjp(_rev_grad_fwd, _rev_grad_bwd)


class LagLambda:
    """JAX port of the PyTorch LagLambda module (hot path, no Pallas launch)."""

    def __init__(self):
        # Matches torch.Tensor([0]) -> [0.0].
        self.lag_lambda = jnp.zeros((1,), dtype=jnp.float32)

    def __call__(self) -> jax.Array:
        return rev_grad(self.lag_lambda)


# ---------------------------------------------------------------------------
# Mandated Pallas kernel: gridless SMEM identity on the (1,) f32 parameter.
# Used only in tests — never on the training hot loop.
# ---------------------------------------------------------------------------
def _revgrad_identity_kernel(lam_ref, out_ref):
    # Scalar load + scalar store on the SMEM path (sld/sst) — no vregs,
    # no padded VMEM tile, no masked vector stores.
    out_ref[0] = lam_ref[0]


def _revgrad_identity_pallas(lam: jax.Array) -> jax.Array:
    # lam: f32[1] -> f32[1]  (forward identity of RevGrad)
    return pl.pallas_call(
        _revgrad_identity_kernel,
        out_shape=jax.ShapeDtypeStruct(lam.shape, lam.dtype),
        in_specs=[pl.BlockSpec(memory_space=pltpu.MemorySpace.SMEM)],
        out_specs=pl.BlockSpec(memory_space=pltpu.MemorySpace.SMEM),
        # No input_output_aliases: parameter buffer stays live for the optimizer.
        cost_estimate=pl.CostEstimate(flops=0, transcendentals=0, bytes_accessed=8),
    )(lam)


@jax.custom_vjp
def rev_grad_pallas(lam: jax.Array) -> jax.Array:
    """Pallas-backed RevGrad: identity forward, -g backward.

    Safe to differentiate (carries the same VJP as rev_grad), so it cannot
    silently lose the gradient-reversal semantics if placed on a grad path.
    """
    return _revgrad_identity_pallas(lam)


def _rev_grad_pallas_fwd(lam):
    return _revgrad_identity_pallas(lam), None


def _rev_grad_pallas_bwd(_, g):
    return (-g,)


rev_grad_pallas.defvjp(_rev_grad_pallas_fwd, _rev_grad_pallas_bwd)


# ---------------------------------------------------------------------------
# Consumer-fusion pattern (perf review item 2): the scalar rides for free in
# SMEM of a kernel that is already launching — no standalone identity launch.
# Demonstrated with a tiny Lagrangian-penalty consumer: out = lam * constraint.
# ---------------------------------------------------------------------------
def _lagrangian_consumer_kernel(lam_ref, c_ref, out_ref):
    # lam_ref: (1,) f32 in SMEM; c_ref/out_ref: VMEM tiles.
    out_ref[...] = lam_ref[0] * c_ref[...]


def lagrangian_penalty(lam: jax.Array, constraint: jax.Array) -> jax.Array:
    # constraint: small (8, 128) f32 tile — one vreg, gridless.
    return pl.pallas_call(
        _lagrangian_consumer_kernel,
        out_shape=jax.ShapeDtypeStruct(constraint.shape, constraint.dtype),
        in_specs=[
            pl.BlockSpec(memory_space=pltpu.MemorySpace.SMEM),
            pl.BlockSpec(memory_space=pltpu.MemorySpace.VMEM),
        ],
        out_specs=pl.BlockSpec(memory_space=pltpu.MemorySpace.VMEM),
    )(lam, constraint)


if __name__ == "__main__":
    key = jax.random.PRNGKey(0)
    k_lam, k_con = jax.random.split(key)

    # --- Module forward (hot path: plain identity inside custom_vjp) -------
    module = LagLambda()
    out = jax.block_until_ready(module())
    assert out.shape == (1,)
    assert out.dtype == jnp.float32
    assert float(out[0]) == 0.0

    # Gradient-reversal semantics check (hot path).
    grad = jax.block_until_ready(
        jax.grad(lambda lam: jnp.sum(rev_grad(lam)))(module.lag_lambda)
    )
    assert float(grad[0]) == -1.0

    # --- Pallas identity kernel (test-only path) ----------------------------
    lam_test = jax.random.normal(k_lam, (1,), dtype=jnp.float32)
    pallas_out = jax.block_until_ready(rev_grad_pallas(lam_test))
    assert pallas_out.shape == (1,)
    assert pallas_out.dtype == jnp.float32
    assert float(pallas_out[0]) == float(lam_test[0])

    # Pallas path keeps the gradient-reversal VJP.
    pallas_grad = jax.block_until_ready(
        jax.grad(lambda lam: jnp.sum(rev_grad_pallas(lam)))(lam_test)
    )
    assert float(pallas_grad[0]) == -1.0

    # Kernel reproduces the module's forward on its parameter.
    pallas_param_out = jax.block_until_ready(rev_grad_pallas(module.lag_lambda))
    assert float(pallas_param_out[0]) == float(out[0])

    # --- Consumer-fusion demo: lam consumed via SMEM in a downstream kernel -
    constraint = jax.random.normal(k_con, (8, 128), dtype=jnp.float32)
    fused = jax.block_until_ready(lagrangian_penalty(lam_test, constraint))
    ref = lam_test[0] * constraint
    assert jnp.allclose(fused, ref, rtol=1e-6, atol=1e-6)

    # TODO(synk): the backward gradient negation has no forward-pass compute
    # to kernelize; it is expressed with jax.custom_vjp in plain JAX.
    print("KERNEL_OK")
</pallas_src>

<mosaic_0001>
module attributes {stable_mosaic.version = 11 : i64} {
  func.func @_revgrad_identity_kernel(%arg0: memref<1xf32, #tpu.memory_space<smem>>, %arg1: memref<1xf32, #tpu.memory_space<smem>>) attributes {dimension_semantics = [], scalar_prefetch = 0 : i64, scratch_operands = 0 : i64, tpu.core_type = #tpu.core_type<tc>} {
    %c0 = arith.constant 0 : index
    %0 = memref.load %arg0[%c0] : memref<1xf32, #tpu.memory_space<smem>>
    %c0_0 = arith.constant 0 : index
    %1 = memref.load %arg1[%c0_0] : memref<1xf32, #tpu.memory_space<smem>>
    memref.store %0, %arg1[%c0_0] : memref<1xf32, #tpu.memory_space<smem>>
    return
  }
}

</mosaic_0001>

<bundles_post_ra>
// kernel: tpu_custom_call.1
= control target key start
LH: loop header
LB: loop body
LE: loop exit
PB: predicated region body
PF: predicated region fallthrough
CT: control target
= control target key end

     0   :  { %7 = vsyncpa [#allocation4], 0  ;;  %s43_s11 = smov [#allocation3]   ;;  %s60_s0 = inlined_call_operand.<no memory space> [shape: f32[1], index: 0, kind: input, shape index: {}]   ;;  %s61_s1 = inlined_call_operand.hbm [shape: f32[1], index: 1, kind: output, shape index: {}]  }
   0x1   :  { %12 = sst [smem:[#allocation3]] %s60_s0  ;;  %s18_s10 = sshll.u32 %s61_s1, 4  ;;  %s19_s10 = int_to_ptr.hbm [resolvable:$true] %s18_s10 }
   0x2   :  { %21 = dma.smem_to_hbm %s43_s11, 16, %s19_s10, [#allocation4]  }
   0x3   :  { %41 = dma.done.wait [#allocation4], 16  }
   0x4   :  { %42 = vsyncadd [#allocation4], 4294967280 }
   0x5   :  { %26 = sfence }
   0x6   :  { %27 = vsyncpa [#allocation4], 1 }

</bundles_post_ra>
